<compile_context>
chip_gen: v6e
topology: v6e:2x2x1
jax: 0.10.0
libtpu: 0.0.40
codegen_flags: <defaults>
</compile_context>

<pallas_src>
import jax
import jax.numpy as jnp
import numpy as np
from jax.experimental import pallas as pl
from jax.experimental.pallas import tpu as pltpu


def _basic_conv_kernel(p_ref, w_ref, scale_ref, shift_ref, o_ref):
    """Fused im2col conv + folded-BN affine + LeakyReLU.

    p_ref:     (K, TL)    im2col patches, lane-dense (spatial positions on lanes)
    w_ref:     (Cout, K)  flattened conv weights (K order = Cin, KH, KW)
    scale_ref: (Cout, 1)  folded BN scale (f32)
    shift_ref: (Cout, 1)  folded BN shift (f32)
    o_ref:     (Cout, TL) output slab
    """
    # One MXU contraction; accumulation stays in f32 (MRB-friendly on v7x).
    acc = jnp.dot(w_ref[...], p_ref[...], preferred_element_type=jnp.float32)
    # Folded BatchNorm (inference): per-sublane scale/shift, broadcast on lanes.
    y = acc * scale_ref[...] + shift_ref[...]
    # LeakyReLU, default negative_slope = 0.01 (f32 epilogue, v5e-safe).
    y = jnp.where(y > 0, y, jnp.float32(0.01) * y)
    o_ref[...] = y.astype(o_ref.dtype)


def basic_conv(x_nchw, weight_oihw, gamma, beta, running_mean, running_var,
               *, eps=1e-5, stride=1, padding=1, dilation=1,
               compute_dtype=jnp.bfloat16, tile_l=256):
    """Forward pass of BasicConv (conv -> BN(eval) -> LeakyReLU), NCHW in/out."""
    N, Cin, H, W = x_nchw.shape
    Cout, Cin_w, KH, KW = weight_oihw.shape
    assert Cin_w == Cin  # TODO(synk): grouped conv not implemented
    Ho = (H + 2 * padding - dilation * (KH - 1) - 1) // stride + 1
    Wo = (W + 2 * padding - dilation * (KW - 1) - 1) // stride + 1

    # ---- layout plumbing in plain XLA (cheap; keeps the kernel lane-dense) ----
    x_pad = jnp.pad(x_nchw, ((0, 0), (0, 0),
                             (padding, padding), (padding, padding)))
    # im2col: build (Cin, KH, KW, N, Ho, Wo) then flatten to (K, L).
    taps = []
    for kh in range(KH):
        row = []
        for kw in range(KW):
            h0, w0 = kh * dilation, kw * dilation
            row.append(x_pad[:, :,
                             h0:h0 + (Ho - 1) * stride + 1:stride,
                             w0:w0 + (Wo - 1) * stride + 1:stride])
        taps.append(jnp.stack(row, axis=0))                 # (KW, N, Cin, Ho, Wo)
    patches = jnp.stack(taps, axis=0)                       # (KH, KW, N, Cin, Ho, Wo)
    patches = jnp.transpose(patches, (3, 0, 1, 2, 4, 5))    # (Cin, KH, KW, N, Ho, Wo)

    K = Cin * KH * KW
    L = N * Ho * Wo
    patches2d = patches.reshape(K, L).astype(compute_dtype)
    # OIHW reshape gives K ordered as (Cin, KH, KW) — matches patches2d.
    w2d = weight_oihw.reshape(Cout, K).astype(compute_dtype)

    # Fold BN (inference mode) into per-channel scale/shift, kept in f32.
    scale = (gamma / jnp.sqrt(running_var + eps)).astype(jnp.float32)
    shift = (beta - running_mean * scale).astype(jnp.float32)
    scale2 = scale.reshape(Cout, 1)
    shift2 = shift.reshape(Cout, 1)

    # Lane tile: multiple of 128, small enough for v7x's 64 MiB VMEM even with
    # double-buffering at production sizes.
    tl = max(128, min(tile_l, pl.cdiv(L, 128) * 128))
    l_pad = pl.cdiv(L, tl) * tl
    if l_pad != L:
        patches2d = jnp.pad(patches2d, ((0, 0), (0, l_pad - L)))

    out2d = pl.pallas_call(
        _basic_conv_kernel,
        out_shape=jax.ShapeDtypeStruct((Cout, l_pad), x_nchw.dtype),
        grid=(l_pad // tl,),
        in_specs=[
            pl.BlockSpec((K, tl), lambda i: (0, i)),
            pl.BlockSpec((Cout, K), lambda i: (0, 0)),
            pl.BlockSpec((Cout, 1), lambda i: (0, 0)),
            pl.BlockSpec((Cout, 1), lambda i: (0, 0)),
        ],
        out_specs=pl.BlockSpec((Cout, tl), lambda i: (0, i)),
        compiler_params=pltpu.CompilerParams(
            dimension_semantics=("parallel",)),
    )(patches2d, w2d, scale2, shift2)

    out = out2d[:, :L].reshape(Cout, N, Ho, Wo)
    return jnp.transpose(out, (1, 0, 2, 3))                 # back to NCHW


def _reference(x_nchw, weight_oihw, gamma, beta, running_mean, running_var,
               *, eps=1e-5, padding=1):
    """Pure-JAX f32 reference matching PyTorch eval-mode BasicConv."""
    y = jax.lax.conv_general_dilated(
        x_nchw, weight_oihw,
        window_strides=(1, 1),
        padding=((padding, padding), (padding, padding)),
        dimension_numbers=("NCHW", "OIHW", "NCHW"),
    )
    scale = (gamma / jnp.sqrt(running_var + eps)).reshape(1, -1, 1, 1)
    shift = (beta - running_mean * gamma / jnp.sqrt(running_var + eps)).reshape(1, -1, 1, 1)
    y = y * scale + shift
    return jnp.where(y > 0, y, 0.01 * y)


if __name__ == "__main__":
    key = jax.random.PRNGKey(0)
    k_x, k_w = jax.random.split(key)

    N, Cin, H, W = 2, 4, 16, 16
    Cout, KH, KW = 8, 3, 3

    x = jax.random.normal(k_x, (N, Cin, H, W), dtype=jnp.float32)
    weight = 0.1 * jax.random.normal(k_w, (Cout, Cin, KH, KW), dtype=jnp.float32)

    # Deterministic BatchNorm parameters / running statistics.
    gamma = 1.0 + 0.1 * jnp.arange(Cout, dtype=jnp.float32)
    beta = 0.05 * jnp.arange(Cout, dtype=jnp.float32)
    running_mean = 0.01 * jnp.arange(Cout, dtype=jnp.float32)
    running_var = 1.0 + 0.02 * jnp.arange(Cout, dtype=jnp.float32)

    out = basic_conv(x, weight, gamma, beta, running_mean, running_var)
    out = jax.block_until_ready(out)

    ref = _reference(x, weight, gamma, beta, running_mean, running_var)
    # bf16 MXU inputs (f32 accumulation) vs f32 reference -> modest tolerance.
    np.testing.assert_allclose(np.asarray(out), np.asarray(ref),
                               rtol=2e-2, atol=2e-2)

    print("KERNEL_OK")
</pallas_src>

<mosaic_0001>
module attributes {stable_mosaic.version = 11 : i64} {
  func.func @_basic_conv_kernel(%arg0: i32, %arg1: memref<36x256xbf16, #tpu.memory_space<vmem>>, %arg2: memref<8x36xbf16, #tpu.memory_space<vmem>>, %arg3: memref<8x1xf32, #tpu.memory_space<vmem>>, %arg4: memref<8x1xf32, #tpu.memory_space<vmem>>, %arg5: memref<8x256xf32, #tpu.memory_space<vmem>>) attributes {dimension_semantics = [#tpu.dimension_semantics<parallel>], iteration_bounds = array<i64: 2>, scalar_prefetch = 0 : i64, scratch_operands = 0 : i64, tpu.core_type = #tpu.core_type<tc>, window_params = [{transform_indices = @transform_0, window_bounds = array<i64: 36, 256>}, {pipeline_mode = #tpu.pipeline_mode<synchronous>, transform_indices = @transform_1, window_bounds = array<i64: 8, 36>}, {pipeline_mode = #tpu.pipeline_mode<synchronous>, transform_indices = @transform_2, window_bounds = array<i64: 8, 1>}, {pipeline_mode = #tpu.pipeline_mode<synchronous>, transform_indices = @transform_3, window_bounds = array<i64: 8, 1>}, {transform_indices = @transform_4, window_bounds = array<i64: 8, 256>}]} {
    %c0 = arith.constant 0 : index
    %c0_0 = arith.constant 0 : index
    %0 = vector.load %arg2[%c0, %c0_0] : memref<8x36xbf16, #tpu.memory_space<vmem>>, vector<8x36xbf16>
    %c0_1 = arith.constant 0 : index
    %c0_2 = arith.constant 0 : index
    %1 = vector.load %arg1[%c0_1, %c0_2] : memref<36x256xbf16, #tpu.memory_space<vmem>>, vector<36x256xbf16>
    %cst = arith.constant dense<0.000000e+00> : vector<8x256xf32>
    %2 = tpu.matmul %0, %1, %cst {dimension_numbers = #tpu.dot_dimension_numbers<[1], [0], [0], [1], [0, 0, 1, 1], [], []>} : vector<8x36xbf16>, vector<36x256xbf16>, vector<8x256xf32> -> vector<8x256xf32>
    %c0_3 = arith.constant 0 : index
    %c0_4 = arith.constant 0 : index
    %3 = vector.load %arg3[%c0_3, %c0_4] : memref<8x1xf32, #tpu.memory_space<vmem>>, vector<8x1xf32>
    %4 = vector.broadcast %3 : vector<8x1xf32> to vector<8x256xf32>
    %5 = arith.mulf %2, %4 : vector<8x256xf32>
    %c0_5 = arith.constant 0 : index
    %c0_6 = arith.constant 0 : index
    %6 = vector.load %arg4[%c0_5, %c0_6] : memref<8x1xf32, #tpu.memory_space<vmem>>, vector<8x1xf32>
    %7 = vector.broadcast %6 : vector<8x1xf32> to vector<8x256xf32>
    %8 = arith.addf %5, %7 : vector<8x256xf32>
    %cst_7 = arith.constant 0.000000e+00 : f32
    %9 = vector.broadcast %cst_7 : f32 to vector<8x256xf32>
    %10 = arith.cmpf ogt, %8, %9 : vector<8x256xf32>
    %cst_8 = arith.constant 0.00999999977 : f32
    %11 = vector.broadcast %cst_8 : f32 to vector<8x256xf32>
    %12 = arith.mulf %11, %8 : vector<8x256xf32>
    %13 = arith.select %10, %8, %12 : vector<8x256xi1>, vector<8x256xf32>
    %c0_9 = arith.constant 0 : index
    %c0_10 = arith.constant 0 : index
    %14 = vector.load %arg5[%c0_9, %c0_10] : memref<8x256xf32, #tpu.memory_space<vmem>>, vector<8x256xf32>
    tpu.vector_store %arg5[%c0_9, %c0_10], %13 {strides = array<i32>} : memref<8x256xf32, #tpu.memory_space<vmem>>, vector<8x256xf32>,
    return
  }
  func.func @transform_0(%arg0: i32) -> (i32, i32) {
    %c0_i32 = arith.constant 0 : i32
    %c0_i32_0 = arith.constant 0 : i32
    return %c0_i32, %arg0 : i32, i32
  }
  func.func @transform_1(%arg0: i32) -> (i32, i32) {
    %c0_i32 = arith.constant 0 : i32
    %c0_i32_0 = arith.constant 0 : i32
    %c0_i32_1 = arith.constant 0 : i32
    return %c0_i32, %c0_i32_0 : i32, i32
  }
  func.func @transform_2(%arg0: i32) -> (i32, i32) {
    %c0_i32 = arith.constant 0 : i32
    %c0_i32_0 = arith.constant 0 : i32
    %c0_i32_1 = arith.constant 0 : i32
    return %c0_i32, %c0_i32_0 : i32, i32
  }
  func.func @transform_3(%arg0: i32) -> (i32, i32) {
    %c0_i32 = arith.constant 0 : i32
    %c0_i32_0 = arith.constant 0 : i32
    %c0_i32_1 = arith.constant 0 : i32
    return %c0_i32, %c0_i32_0 : i32, i32
  }
  func.func @transform_4(%arg0: i32) -> (i32, i32) {
    %c0_i32 = arith.constant 0 : i32
    %c0_i32_0 = arith.constant 0 : i32
    return %c0_i32, %arg0 : i32, i32
  }
}

</mosaic_0001>

<bundles_post_ra>
// kernel: tpu_custom_call.1
= control target key start
LH: loop header
LB: loop body
LE: loop exit
PB: predicated region body
PF: predicated region fallthrough
CT: control target
= control target key end

     0   :  { %9 = vsyncpa [#allocation3], 0  ;;  %s771_s0 = inlined_call_operand.hbm [shape: bf16[36,512], index: 0, kind: input, shape index: {}]   ;;  %s772_s1 = inlined_call_operand.vmem [shape: bf16[8,36], index: 1, kind: input, shape index: {}]   ;;  %s773_s2 = inlined_call_operand.vmem [shape: f32[8,1], index: 2, kind: input, shape index: {}]   ;;  %s774_s3 = inlined_call_operand.vmem [shape: f32[8,1], index: 3, kind: input, shape index: {}]   ;;  %s775_s4 = inlined_call_operand.hbm [shape: f32[8,512], index: 4, kind: output, shape index: {}]  }
   0x1   :  { %11 = vsyncpa [#allocation3 + $0x1], 0 }
   0x2   :  { %12 = vsyncpa [#allocation4], 0 }
   0x3   :  { %14 = vsyncpa [#allocation4 + $0x1], 0  ;;  %s619_s15 = smov 0   ;;  %s621_s16 = smov 0  }
   0x4   :  { %s623_s17 = smov 0   ;;  %s625_s18 = smov 0  }
   0x5 LB: > { %s640_s19 = sadd.s32 4294967295, %s586_s18   ;;  %s411_s20 = sadd.s32 4294967294, %s586_s18   ;;  %s586_s18 = sphi %s625_s18, %s790_s18   ;;  %s582_s17 = sphi %s623_s17, %s789_s17   ;;  %s578_s16 = sphi %s621_s16, %s788_s16   ;;  %s574_s15 = sphi %s619_s15, %s787_s15  }
   0x6   : > { %s644_s21 = sadd.s32 1, %s586_s18   ;;  %s27_s22 = sadd.s32 1, %s582_s17 }
   0x7   : > { %s24_s23 = ssub.s32 %s586_s18, %s644_s21  ;;  %p34_p0 = scmp.ne.s32.totalorder %s582_s17, %s578_s16 }
   0x8   : > { %p25_p1 = scmp.eq.s32.totalorder %s24_s23, 0  ;;  %p35_p2 = scmp.eq.s32.totalorder %s586_s18, 0 }
   0x9   : > { %p40_p3 = scmp.ne.s32.totalorder %s578_s16, %s574_s15  ;;  %p41_p4 = scmp.eq.s32.totalorder %s640_s19, 0 }
   0xa   : > { %s656_s24 = scalar_select %p25_p1, %s582_s17, %s27_s22  }
   0xb   : > { %p36_p5 = por %p35_p2, %p34_p0  ;;  %p658_p6 = por %p41_p4, %p40_p3 }
   0xc   : > { %p127_p7 = scmp.eq.s32.totalorder %s640_s19, 1  ;;  %p133_p8 = scmp.eq.s32.totalorder %s411_s20, 1 }
   0xd   : > { %s778_s25 = scalar_select %p658_p6, 1, 0 }
   0xe   : > { %p447_p10 = scmp.lt.s32.totalorder %s586_s18, 2  ;;  %p665_p11 = por %p127_p7, %p34_p0 }
   0xf   : > { %p669_p12 = por %p133_p8, %p40_p3  ;;  %s162_s28 = sand.u32 1, %s582_s17  }
  0x10   : > { %s779_s26 = scalar_select %p665_p11, 1, 0 }
  0x11   : > { %s780_s27 = scalar_select %p669_p12, 1, 0 }
  0x12   : > { %s431_s29 = sshll.u32 %s586_s18, 7  ;;  %s433_s30 = smul.u32 40, %s162_s28 }
  0x13   : > { %s678_s7 = scalar_lea.hbm %s771_s0, %s431_s29  ;;  %p680_p13 = pnand %p447_p10, %p36_p5 }
  0x14   : > { %s166_s9 = scalar_lea.vmem [#allocation2], %s433_s30  ;;  %s687_s11 = scalar_lea.sflag [#allocation3], %s162_s28 }
  0x15   : > { %s173_s10 = sshll.u32 %s166_s9, 4  ;;  %s494_s12 = scalar_lea.hbm %s678_s7, 640  ;;  %s684_s10 = int_to_ptr.vmem [resolvable:$true] %s173_s10 }
  0x16   : > { %p495_p1 = scmp.ne.s32.totalorder %s678_s7, %s494_s12  ;;  %p496_p2 = pneg %p680_p13 }
  0x17   : > { %s499_s20 = scalar_lea.hbm %s771_s0, 1280  ;;  %p500_p5 = scmp.lt.s32.totalorder %s678_s7, %s771_s0 }
  0x18   : > { %p497_p3 = pnand %p496_p2, %p495_p1  ;;  %p501_p7 = scmp.lt.s32.totalorder %s499_s20, %s494_s12 }
  0x1a   : > { %p498_p4 = pneg %p497_p3  ;;  %p502_p8 = por %p501_p7, %p500_p5 }
  0x1c   : > { %p503_p10 = pnand %p502_p8, %p498_p4 }
  0x1e   : > { %506 = shalt.err (!%p503_p10)
}
  0x1f   : > { %s507_s28 = scalar_lea.vmem %s684_s10, 640  ;;  %s588_s29 = smov [#allocation2]  }
  0x20   : > { %p508_p9 = scmp.ne.s32.totalorder %s684_s10, %s507_s28  ;;  %s512_s30 = sshll.u32 %s588_s29, 4  ;;  %s513_s30 = int_to_ptr.vmem [resolvable:$false] %s512_s30 }
  0x21   : > { %s514_s5 = scalar_lea.vmem %s513_s30, 1280  ;;  %p515_p3 = scmp.lt.s32.totalorder %s684_s10, %s513_s30 }
  0x22   : > { %p510_p0 = pnand %p508_p9, %p496_p2  ;;  %p516_p12 = scmp.lt.s32.totalorder %s514_s5, %s507_s28 }
  0x24   : > { %p511_p1 = pneg %p510_p0  ;;  %p517_p11 = por %p516_p12, %p515_p3 }
  0x26   : > { %p518_p6 = pnand %p517_p11, %p511_p1 }
  0x28   : > { %521 = shalt.err (!%p518_p6)
}
  0x29   : > { %s589_s6 = smov 256   ;;  %s590_s9 = smov 128  }
  0x2a   : > { %s591_s12 = smov 8   ;;  %p181_p9 = scmp.lt.s32.totalorder %s586_s18, 3 }
  0x2b   : > { %442 = dma.hbm_to_vmem [thread:$0]  (!%p680_p13), %s678_s7, 640, %s684_s10, %s687_s11, %s589_s6, %s590_s9, %s591_s12  }
  0x2c   : > { %p782_p0 = scmp.ge.s32.totalorder %s586_s18, 1 }
  0x2e   : > { %p182_p2 = pnand %p782_p0, %p181_p9 }
  0x2f   : > { %s712_s13 = sand.u32 (!%p182_p2), 1, %s578_s16   ;;  %p783_p6 = scmp.ne.s32.totalorder (!%p182_p2), %s778_s25, 0 }
  0x30   : > { %185 = sbr.rel (%p182_p2) target bundleno = 284 (0x11c), region = 36  ;;  %s188_s20 = scalar_lea.sflag (!%p182_p2), [#allocation3], %s712_s13 }
  0x31   : > { %s434_s14 = smul.u32 (!%p182_p2), 40, %s712_s13 }
  0x33   : > { %s191_s22 = scalar_lea.vmem (!%p182_p2), [#allocation2], %s434_s14 }
  0x35   : > { %565 = dma.done.wait (%p783_p6), %s188_s20, 640  }
  0x36   : > { %567 = vsyncadd (%p783_p6), %s188_s20, 4294966656  ;;  %v592_v0 = vmov 0   ;;  %v224_v1 = vld [vmem:[%s191_s22 + $0x20] sm:$0x33]  ;;  %vm254_vm0 = vcmask 1041408   ;;  %vm250_vm1 = vcmask 293888  }
  0x37   : > { %293 = vmatprep.mubr.bf16.mxu0 %v592_v0  ;;  %485 = vset.pattern.permute.xlu0 %v592_v0  ;;  %v423_v2 = vcombine.high %v224_v1, %v224_v1  ;;  %v422_v3 = vcombine.low %v224_v1, %v224_v1  ;;  %v488_v4 = vld [vmem:[%s191_s22 + $0x14] ss:$8 sps:$4 sm:$0xff]   ;;  %v490_v7 = vld [vmem:[%s191_s22 + $0x10] ss:$8 sps:$4 sm:$0xff]   ;;  %v491_v8 = vld [vmem:[%s191_s22 + $0x4] ss:$8 sps:$4 sm:$0xff]  }
  0x38   : > { %v302_v6 = vld [vmem:[%s773_s2] sm:$0xff]  ;;  %s417_s28 = sshll.u32 %s712_s13, 4  ;;  %s432_s29 = sshll.u32 %s640_s19, 8 }
  0x39   : > { %424 = vmatprep.subr.msk.bf16.mxu0 %vm254_vm0, %v423_v2  ;;  %v256_v5 = vsel %vm254_vm0, %v422_v3, 0  ;;  %305 = vperm.xlu0 %485, %v302_v6   ;;  %v310_v9 = vld [vmem:[%s774_s3] sm:$0xff]  ;;  %s215_s30 = scalar_lea.vmem [#allocation5], %s417_s28  ;;  %s734_s12 = scalar_lea.hbm %s775_s4, %s432_s29 }
  0x3a   : > { %272 = vmatpush1.bf16.msra.mxu0 %v256_v5  ;;  %v493_v10 = vld [vmem:[%s191_s22] ss:$8 sps:$4 sm:$0xff]   ;;  %s341_s5 = sshll.u32 %s215_s30, 4  ;;  %s327_s14 = scalar_lea.sflag [#allocation4], %s712_s13  ;;  %s342_s5 = int_to_ptr.vmem [resolvable:$true] %s341_s5 }
  0x3b   : > { %273 = vmatprep.subr.bf16.mxu0 %v488_v4  ;;  %v219_v11 = vld [vmem:[%s772_s1] sm:$0xf]  ;;  %s522_s20 = scalar_lea.vmem %s342_s5, 256  ;;  %p784_p12 = scmp.ne.s32.totalorder %s779_s26, 0 }
  0x3c   : > { %p523_p11 = scmp.ne.s32.totalorder %s342_s5, %s522_s20  ;;  %s593_s19 = smov [#allocation5]  }
  0x3d   : > { %313 = vperm.xlu0 %485, %v310_v9   ;;  %s526_s22 = sshll.u32 %s593_s19, 4  ;;  %s527_s22 = int_to_ptr.vmem [resolvable:$false] %s526_s22 }
  0x3e   : > { %274 = vmatpush1.bf16.msra.mxu0 %v490_v7  ;;  %p524_p13 = pnand %p523_p11, %p784_p12  ;;  %s528_s7 = scalar_lea.vmem %s527_s22, 512 }
  0x3f   : > { %275 = vmatprep.subr.bf16.mxu0 %v491_v8  ;;  %p529_p5 = scmp.lt.s32.totalorder %s342_s5, %s527_s22  ;;  %p530_p7 = scmp.lt.s32.totalorder %s528_s7, %s522_s20 }
  0x40   : > { %p525_p4 = pneg %p524_p13 }
  0x41   : > { %p531_p8 = por %p530_p7, %p529_p5 }
  0x42   : > { %276 = vmatpush1.bf16.msra.mxu0 %v493_v10 }
  0x43   : > { %p532_p10 = pnand %p531_p8, %p525_p4 }
  0x45   : > { %425 = vmatmul.mubr.msk.bf16.vlgmr.msra.gmra.mxu0 %vm250_vm1, %v219_v11 }
  0xb4   : > { %v306_v12 = vpop.permute.xlu0 %305 }
  0xb8   : > { %v314_v15 = vpop.permute.xlu0 %313 }
 0x105   : > { %v295_v13 = vpop.f32.mrf.mxu0 }
 0x106   : > { %v308_v14 = vmul.f32 %v306_v12, %v295_v13 }
 0x107   : > { %v297_v16 = vpop.f32.mrf.mxu0 }
 0x108   : > { %v316_v17 = vadd.f32 %v314_v15, %v308_v14  ;;  %v309_v18 = vmul.f32 %v306_v12, %v297_v16 }
 0x109   : > { %v299_v19 = vpop.f32.mrf.mxu0 }
 0x10a   : > { %vm318_vm2 = vcmp.gt.f32.partialorder %v316_v17, 0.0  ;;  %v320_v20 = vmul.f32 0.01, %v316_v17  ;;  %v317_v21 = vadd.f32 %v314_v15, %v309_v18 }
 0x10b   : > { %v300_v22 = vpop.f32.mrf.mxu0 }
 0x10c   : > { %v322_v23 = vsel %vm318_vm2, %v316_v17, %v320_v20  ;;  %vm319_vm3 = vcmp.gt.f32.partialorder %v317_v21, 0.0  ;;  %v321_v24 = vmul.f32 0.01, %v317_v21 }
 0x10d   : > { %324 = vst [vmem:[%s215_s30] sm:$0xff] %v322_v23 }
 0x10e   : > { %v323_v25 = vsel %vm319_vm3, %v317_v21, %v321_v24 }
 0x10f   : > { %325 = vst [vmem:[%s215_s30 + $0x8] sm:$0xff] %v323_v25 }
 0x110   : > { %535 = shalt.err (!%p532_p10)
}
 0x111   : > { %s536_s8 = scalar_lea.hbm %s734_s12, 256  ;;  %s540_s10 = scalar_lea.hbm %s775_s4, 512 }
 0x112   : > { %p537_p1 = scmp.ne.s32.totalorder %s734_s12, %s536_s8  ;;  %p541_p0 = scmp.lt.s32.totalorder %s734_s12, %s775_s4 }
 0x113   : > { %p542_p2 = scmp.lt.s32.totalorder %s540_s10, %s536_s8 }
 0x114   : > { %p538_p3 = pnand %p537_p1, %p784_p12 }
 0x115   : > { %p543_p6 = por %p542_p2, %p541_p0 }
 0x116   : > { %p539_p9 = pneg %p538_p3 }
 0x118   : > { %p544_p11 = pnand %p543_p6, %p539_p9 }
 0x11a   : > { %547 = shalt.err (!%p544_p11)
}
 0x11b   : > { %437 = dma.vmem_to_hbm [thread:$0]  (%p784_p12), %s342_s5, 256, %s734_s12, %s327_s14  }
 0x11c PF: > { %s353_s28 = sand.u32 1, %s574_s15   ;;  %p785_p13 = scmp.ne.s32.totalorder %s780_s27, 0 }
 0x11d   : > { %p786_p4 = scmp.ge.s32.totalorder %s586_s18, 2  ;;  %s354_s29 = scalar_lea.sflag [#allocation4], %s353_s28 }
 0x11f   : > { %p444_p5 = pnand %p786_p4, %p785_p13 }
 0x121   : > { %p445_p7 = pneg %p444_p5 }
 0x123   : > { %569 = dma.done.wait (%p445_p7), %s354_s29, 256  }
 0x124   : > { %571 = vsyncadd (%p445_p7), %s354_s29, 4294967040  ;;  %p17_p8 = scmp.ge.s32.totalorder %s644_s21, 4   ;;  %s787_s15 = smov %s578_s16 }
 0x125   : > { %s788_s16 = smov %s582_s17  ;;  %s789_s17 = smov %s656_s24 }
 0x126   : > { %s790_s18 = smov %s644_s21  ;;  %19 = sbr.rel (!%p17_p8) target bundleno = 5 (0x5), region = 81 }
 0x12b   :  { %359 = vsyncpa [#allocation3], 1 }
 0x12c   :  { %361 = vsyncpa [#allocation3 + $0x1], 1 }
 0x12d   :  { %362 = vsyncpa [#allocation4], 1 }
 0x12e   :  { %364 = vsyncpa [#allocation4 + $0x1], 1 }

</bundles_post_ra>
